<compile_context>
chip_gen: v7x
topology: tpu7x:2x2x1
jax: 0.10.0
libtpu: 0.0.40
codegen_flags: <defaults>
</compile_context>

<pallas_src>
import functools

import jax
import jax.numpy as jnp
from jax.experimental import pallas as pl
from jax.experimental.pallas import tpu as pltpu

INPUT_SIZE = 784        # 28 * 28
NUM_CLASSES = 10
PADDED_CLASSES = 128    # lane-dense output width (pad 10 -> 128)


def linear_kernel(x_ref, w_ref, b_ref, o_ref):
    # x_ref: (TB, 784) f32   w_ref: (784, 128) f32
    # b_ref: (1, 128)  f32   o_ref: (TB, 128)  bf16
    acc = jnp.dot(x_ref[...], w_ref[...], preferred_element_type=jnp.float32)
    o_ref[...] = (acc + b_ref[...]).astype(o_ref.dtype)


def _round_up(x, m):
    return ((x + m - 1) // m) * m


def _choose_tile_b(B, tb):
    # Multiple of 8 sublanes, capped at `tb`, and small enough that there are
    # at least 2 grid steps once B >= 16 (so v7x can use both TensorCores).
    half = _round_up(max(1, -(-B // 2)), 8)
    return max(8, min(tb, half))


def prepare_params(weight, bias):
    """One-time parameter prep (do NOT redo per forward call).

    weight: (NUM_CLASSES, INPUT_SIZE) f32 (torch nn.Linear convention)
    bias:   (NUM_CLASSES,) f32
    returns w_pad (784, 128) f32, b_pad (1, 128) f32
    """
    w_pad = jnp.zeros((INPUT_SIZE, PADDED_CLASSES), jnp.float32)
    w_pad = w_pad.at[:, :NUM_CLASSES].set(weight.T.astype(jnp.float32))
    b_pad = jnp.zeros((1, PADDED_CLASSES), jnp.float32)
    b_pad = b_pad.at[:, :NUM_CLASSES].set(bias.astype(jnp.float32))
    return w_pad, b_pad


@functools.partial(jax.jit, static_argnames=("tb",))
def mnist_model_forward(xb, w_pad, b_pad, *, tb=2048):
    """Equivalent of MnistModel.forward.

    xb:    (B, 1, 28, 28) float32 (NCHW, like PyTorch)
    w_pad: (784, 128) f32, b_pad: (1, 128) f32 from prepare_params
    returns (B, NUM_CLASSES) float32 logits
    """
    B = xb.shape[0]
    # Flatten only: metadata reshape, no dtype cast, no padding copy.
    x2d = xb.reshape(B, INPUT_SIZE)

    tile_b = _choose_tile_b(B, tb)
    grid = (pl.cdiv(B, tile_b),)   # last block may overhang; OOB output writes masked

    cost = pl.CostEstimate(
        flops=2 * B * INPUT_SIZE * PADDED_CLASSES,
        transcendentals=0,
        bytes_accessed=(B * INPUT_SIZE * 4                 # x stream (f32)
                        + INPUT_SIZE * PADDED_CLASSES * 4  # W (f32, resident)
                        + PADDED_CLASSES * 4               # bias
                        + B * PADDED_CLASSES * 2),         # out (bf16)
    )

    out = pl.pallas_call(
        linear_kernel,
        out_shape=jax.ShapeDtypeStruct((B, PADDED_CLASSES), jnp.bfloat16),
        grid_spec=pl.GridSpec(
            grid=grid,
            in_specs=[
                pl.BlockSpec((tile_b, INPUT_SIZE), lambda i: (i, 0)),          # x: tiled over batch
                pl.BlockSpec((INPUT_SIZE, PADDED_CLASSES), lambda i: (0, 0)),  # W: resident
                pl.BlockSpec((1, PADDED_CLASSES), lambda i: (0, 0)),           # b: resident
            ],
            out_specs=pl.BlockSpec((tile_b, PADDED_CLASSES), lambda i: (i, 0)),
        ),
        compiler_params=pltpu.CompilerParams(
            dimension_semantics=("parallel",),        # shard batch across TCs on v7x
            vmem_limit_bytes=32 * 1024 * 1024,        # f32 x tiles at TB=2048 on v5e's 16MiB default
        ),
        cost_estimate=cost,
    )(x2d, w_pad, b_pad)

    # Slice off padded class lanes and upcast the 10 real logits to f32.
    return out[:, :NUM_CLASSES].astype(jnp.float32)


def init_params(key):
    # Match torch nn.Linear default init: U(-1/sqrt(fan_in), 1/sqrt(fan_in))
    kw, kb = jax.random.split(key)
    bound = 1.0 / jnp.sqrt(jnp.float32(INPUT_SIZE))
    weight = jax.random.uniform(
        kw, (NUM_CLASSES, INPUT_SIZE), jnp.float32, -bound, bound)
    bias = jax.random.uniform(
        kb, (NUM_CLASSES,), jnp.float32, -bound, bound)
    return weight, bias


if __name__ == "__main__":
    key = jax.random.PRNGKey(0)
    k_x, k_p = jax.random.split(key)

    weight, bias = init_params(k_p)
    w_pad, b_pad = prepare_params(weight, bias)      # one-time prep

    # Small batch, dividing tile.
    B = 8
    xb = jax.random.normal(k_x, (B, 1, 28, 28), jnp.float32)   # NCHW like MNIST
    logits = mnist_model_forward(xb, w_pad, b_pad)
    jax.block_until_ready(logits)
    assert logits.shape == (B, NUM_CLASSES)

    # f32 reference (torch-equivalent); only bf16 output rounding separates them.
    ref = xb.reshape(B, INPUT_SIZE) @ weight.T + bias
    assert jnp.allclose(logits, ref, atol=2e-2, rtol=2e-2)

    # Ragged batch: exercises the overhanging last block (no jnp.pad copy).
    B2 = 20
    xb2 = jax.random.normal(jax.random.PRNGKey(1), (B2, 1, 28, 28), jnp.float32)
    logits2 = mnist_model_forward(xb2, w_pad, b_pad)
    jax.block_until_ready(logits2)
    assert logits2.shape == (B2, NUM_CLASSES)
    ref2 = xb2.reshape(B2, INPUT_SIZE) @ weight.T + bias
    assert jnp.allclose(logits2, ref2, atol=2e-2, rtol=2e-2)

    # TODO(synk): training_step / validation_step (cross_entropy, softmax/argmax
    # accuracy) are host-side training utilities, not part of forward().
    print("KERNEL_OK")
</pallas_src>

<mosaic_0001>
module attributes {stable_mosaic.version = 11 : i64} {
  func.func @linear_kernel(%arg0: i32, %arg1: memref<8x784xf32, #tpu.memory_space<vmem>>, %arg2: memref<784x128xf32, #tpu.memory_space<vmem>>, %arg3: memref<1x128xf32, #tpu.memory_space<vmem>>, %arg4: memref<8x128xbf16, #tpu.memory_space<vmem>>) attributes {dimension_semantics = [#tpu.dimension_semantics<parallel>], iteration_bounds = array<i64: 1>, scalar_prefetch = 0 : i64, scratch_operands = 0 : i64, tpu.core_type = #tpu.core_type<tc>, window_params = [{transform_indices = @transform_0, window_bounds = array<i64: 8, 784>}, {pipeline_mode = #tpu.pipeline_mode<synchronous>, transform_indices = @transform_1, window_bounds = array<i64: 784, 128>}, {pipeline_mode = #tpu.pipeline_mode<synchronous>, transform_indices = @transform_2, window_bounds = array<i64: 1, 128>}, {transform_indices = @transform_3, window_bounds = array<i64: 8, 128>}]} {
    %c0 = arith.constant 0 : index
    %c0_0 = arith.constant 0 : index
    %0 = vector.load %arg1[%c0, %c0_0] : memref<8x784xf32, #tpu.memory_space<vmem>>, vector<8x784xf32>
    %c0_1 = arith.constant 0 : index
    %c0_2 = arith.constant 0 : index
    %1 = vector.load %arg2[%c0_1, %c0_2] : memref<784x128xf32, #tpu.memory_space<vmem>>, vector<784x128xf32>
    %cst = arith.constant dense<0.000000e+00> : vector<8x128xf32>
    %2 = tpu.matmul %0, %1, %cst {dimension_numbers = #tpu.dot_dimension_numbers<[1], [0], [0], [1], [0, 0, 1, 1], [], []>} : vector<8x784xf32>, vector<784x128xf32>, vector<8x128xf32> -> vector<8x128xf32>
    %c0_3 = arith.constant 0 : index
    %c0_4 = arith.constant 0 : index
    %3 = vector.load %arg3[%c0_3, %c0_4] : memref<1x128xf32, #tpu.memory_space<vmem>>, vector<1x128xf32>
    %4 = vector.broadcast %3 : vector<1x128xf32> to vector<8x128xf32>
    %5 = arith.addf %2, %4 : vector<8x128xf32>
    %6 = arith.truncf %5 : vector<8x128xf32> to vector<8x128xbf16>
    %c0_5 = arith.constant 0 : index
    %c0_6 = arith.constant 0 : index
    %7 = vector.load %arg4[%c0_5, %c0_6] : memref<8x128xbf16, #tpu.memory_space<vmem>>, vector<8x128xbf16>
    tpu.vector_store %arg4[%c0_5, %c0_6], %6 {strides = array<i32>} : memref<8x128xbf16, #tpu.memory_space<vmem>>, vector<8x128xbf16>,
    return
  }
  func.func @transform_0(%arg0: i32) -> (i32, i32) {
    %c0_i32 = arith.constant 0 : i32
    %c0_i32_0 = arith.constant 0 : i32
    return %arg0, %c0_i32 : i32, i32
  }
  func.func @transform_1(%arg0: i32) -> (i32, i32) {
    %c0_i32 = arith.constant 0 : i32
    %c0_i32_0 = arith.constant 0 : i32
    %c0_i32_1 = arith.constant 0 : i32
    return %c0_i32, %c0_i32_0 : i32, i32
  }
  func.func @transform_2(%arg0: i32) -> (i32, i32) {
    %c0_i32 = arith.constant 0 : i32
    %c0_i32_0 = arith.constant 0 : i32
    %c0_i32_1 = arith.constant 0 : i32
    return %c0_i32, %c0_i32_0 : i32, i32
  }
  func.func @transform_3(%arg0: i32) -> (i32, i32) {
    %c0_i32 = arith.constant 0 : i32
    %c0_i32_0 = arith.constant 0 : i32
    return %arg0, %c0_i32 : i32, i32
  }
}

</mosaic_0001>

<bundles_post_ra>
// kernel: mnist_model_forward.1
= control target key start
LH: loop header
LB: loop body
LE: loop exit
PB: predicated region body
PF: predicated region fallthrough
CT: control target
= control target key end

     0   :  { %vm636_vm0 = vmmov 0   ;;  %vm126_vm1 = vcmask 130048   ;;  %s979_s1 = inlined_call_operand.vmem [shape: f32[784,128], index: 1, kind: input, shape index: {}]   ;;  %s980_s0 = inlined_call_operand.vmem [shape: f32[8,784], index: 0, kind: input, shape index: {}]   ;;  %s981_s2 = inlined_call_operand.vmem [shape: f32[1,128], index: 2, kind: input, shape index: {}]   ;;  %s982_s3 = inlined_call_operand.vmem [shape: bf16[8,128], index: 3, kind: output, shape index: {}]  }
   0x1   :  { %v37_v0 = vld [vmem:[%s979_s1 + $0x80] sm:$0xff]  ;;  %v38_v1 = vld [vmem:[%s979_s1 + $0x88] sm:$0xff]  ;;  %v39_v11 = vld [vmem:[%s979_s1 + $0x90] sm:$0xff] }
   0x2   :  { %v21_v2 = vld [vmem:[%s979_s1] sm:$0xff]  ;;  %v533_v3 = vpack.c.bf16 %v38_v1, %v37_v0  ;;  %v22_v4 = vld [vmem:[%s979_s1 + $0x8] sm:$0xff]  ;;  %v40_v13 = vld [vmem:[%s979_s1 + $0x98] sm:$0xff] }
   0x3   :  { %v69_v5 = vld [vmem:[%s979_s1 + $0x180] sm:$0xff]  ;;  %v70_v6 = vld [vmem:[%s979_s1 + $0x188] sm:$0xff]  ;;  %v535_v7 = vpack.c.bf16 %v22_v4, %v21_v2  ;;  %v23_v14 = vld [vmem:[%s979_s1 + $0x10] sm:$0xff]  ;;  %v537_v16 = vpack.c.bf16 %v40_v13, %v39_v11 }
   0x4   :  { %v565_v8 = vpack.c.bf16 %v70_v6, %v69_v5  ;;  %v53_v9 = vld [vmem:[%s979_s1 + $0x100] sm:$0xff]  ;;  %v54_v10 = vld [vmem:[%s979_s1 + $0x108] sm:$0xff]  ;;  %534 = vmatprep.subr.bf16.mxu0 %v533_v3  ;;  %v24_v15 = vld [vmem:[%s979_s1 + $0x18] sm:$0xff] }
   0x5   :  { %v567_v12 = vpack.c.bf16 %v54_v10, %v53_v9  ;;  %536 = vmatpush3.bf16.msra.mxu0 %v535_v7  ;;  %v539_v17 = vpack.c.bf16 %v24_v15, %v23_v14  ;;  %v71_v18 = vld [vmem:[%s979_s1 + $0x190] sm:$0xff]  ;;  %v72_v19 = vld [vmem:[%s979_s1 + $0x198] sm:$0xff]  ;;  %v41_v23 = vld [vmem:[%s979_s1 + $0xa0] sm:$0xff] }
   0x6   :  { %566 = vmatprep.subr.bf16.mxu1 %v565_v8  ;;  %v55_v20 = vld [vmem:[%s979_s1 + $0x110] sm:$0xff]  ;;  %v569_v21 = vpack.c.bf16 %v72_v19, %v71_v18  ;;  %v56_v22 = vld [vmem:[%s979_s1 + $0x118] sm:$0xff]  ;;  %v42_v24 = vld [vmem:[%s979_s1 + $0xa8] sm:$0xff]  ;;  %538 = vmatprep.subr.bf16.mxu0 %v537_v16 }
   0x7   :  { %568 = vmatpush3.bf16.msra.mxu1 %v567_v12  ;;  %v571_v25 = vpack.c.bf16 %v56_v22, %v55_v20  ;;  %v541_v26 = vpack.c.bf16 %v42_v24, %v41_v23  ;;  %v25_v27 = vld [vmem:[%s979_s1 + $0x20] sm:$0xff]  ;;  %v26_v28 = vld [vmem:[%s979_s1 + $0x28] sm:$0xff]  ;;  %v43_v35 = vld [vmem:[%s979_s1 + $0xb0] sm:$0xff] }
   0x8   :  { %v73_v29 = vld [vmem:[%s979_s1 + $0x1a0] sm:$0xff]  ;;  %570 = vmatprep.subr.bf16.mxu1 %v569_v21  ;;  %v74_v30 = vld [vmem:[%s979_s1 + $0x1a8] sm:$0xff]  ;;  %v543_v33 = vpack.c.bf16 %v26_v28, %v25_v27  ;;  %v44_v36 = vld [vmem:[%s979_s1 + $0xb8] sm:$0xff] }
   0x9   :  { %v57_v31 = vld [vmem:[%s979_s1 + $0x120] sm:$0xff]  ;;  %v58_v32 = vld [vmem:[%s979_s1 + $0x128] sm:$0xff]  ;;  %540 = vmatpush3.bf16.msra.mxu0 %v539_v17  ;;  %v573_v34 = vpack.c.bf16 %v74_v30, %v73_v29  ;;  %v27_v37 = vld [vmem:[%s979_s1 + $0x30] sm:$0xff]  ;;  %v545_v39 = vpack.c.bf16 %v44_v36, %v43_v35 }
   0xa   :  { %542 = vmatprep.subr.bf16.mxu0 %v541_v26  ;;  %v575_v38 = vpack.c.bf16 %v58_v32, %v57_v31  ;;  %v28_v40 = vld [vmem:[%s979_s1 + $0x38] sm:$0xff]  ;;  %v75_v41 = vld [vmem:[%s979_s1 + $0x1b0] sm:$0xff]  ;;  %v45_v46 = vld [vmem:[%s979_s1 + $0xc0] sm:$0xff] }
   0xb   :  { %572 = vmatpush3.bf16.msra.mxu1 %v571_v25  ;;  %v76_v42 = vld [vmem:[%s979_s1 + $0x1b8] sm:$0xff]  ;;  %v59_v44 = vld [vmem:[%s979_s1 + $0x130] sm:$0xff]  ;;  %v46_v47 = vld [vmem:[%s979_s1 + $0xc8] sm:$0xff]  ;;  %v547_v48 = vpack.c.bf16 %v28_v40, %v27_v37 }
   0xc   :  { %574 = vmatprep.subr.bf16.mxu1 %v573_v34  ;;  %v577_v43 = vpack.c.bf16 %v76_v42, %v75_v41  ;;  %v60_v45 = vld [vmem:[%s979_s1 + $0x138] sm:$0xff]  ;;  %v77_v49 = vld [vmem:[%s979_s1 + $0x1c0] sm:$0xff]  ;;  %v78_v50 = vld [vmem:[%s979_s1 + $0x1c8] sm:$0xff]  ;;  %v549_v52 = vpack.c.bf16 %v46_v47, %v45_v46 }
   0xd   :  { %544 = vmatpush3.bf16.msra.mxu0 %v543_v33  ;;  %v579_v51 = vpack.c.bf16 %v60_v45, %v59_v44  ;;  %v29_v53 = vld [vmem:[%s979_s1 + $0x40] sm:$0xff]  ;;  %v30_v54 = vld [vmem:[%s979_s1 + $0x48] sm:$0xff]  ;;  %v581_v56 = vpack.c.bf16 %v78_v50, %v77_v49  ;;  %v47_v58 = vld [vmem:[%s979_s1 + $0xd0] sm:$0xff]  ;;  %v635_v50 = vmov 0.0|0.0  }
   0xe   :  { %546 = vmatprep.subr.bf16.mxu0 %v545_v39  ;;  %v61_v55 = vld [vmem:[%s979_s1 + $0x140] sm:$0xff]  ;;  %v62_v57 = vld [vmem:[%s979_s1 + $0x148] sm:$0xff]  ;;  %v48_v59 = vld [vmem:[%s979_s1 + $0xd8] sm:$0xff]  ;;  %v551_v62 = vpack.c.bf16 %v30_v54, %v29_v53 }
   0xf   :  { %576 = vmatpush3.bf16.msra.mxu1 %v575_v38  ;;  %v79_v60 = vld [vmem:[%s979_s1 + $0x1d0] sm:$0xff]  ;;  %v80_v61 = vld [vmem:[%s979_s1 + $0x1d8] sm:$0xff]  ;;  %v583_v63 = vpack.c.bf16 %v62_v57, %v61_v55  ;;  %v553_v0 = vpack.c.bf16 %v48_v59, %v47_v58  ;;  %v49_v6 = vld [vmem:[%s979_s1 + $0xe0] sm:$0xff] }
  0x10   :  { %578 = vmatprep.subr.bf16.mxu1 %v577_v43  ;;  %v31_v1 = vld [vmem:[%s979_s1 + $0x50] sm:$0xff]  ;;  %v32_v2 = vld [vmem:[%s979_s1 + $0x58] sm:$0xff]  ;;  %v585_v4 = vpack.c.bf16 %v80_v61, %v79_v60  ;;  %v50_v7 = vld [vmem:[%s979_s1 + $0xe8] sm:$0xff]  ;;  %v637_v60 = vmov 0.0  }
  0x11   :  { %548 = vmatpush3.bf16.msra.mxu0 %v547_v48  ;;  %v63_v3 = vld [vmem:[%s979_s1 + $0x150] sm:$0xff]  ;;  %v64_v5 = vld [vmem:[%s979_s1 + $0x158] sm:$0xff]  ;;  %v81_v8 = vld [vmem:[%s979_s1 + $0x1e0] sm:$0xff]  ;;  %v555_v10 = vpack.c.bf16 %v32_v2, %v31_v1  ;;  %v557_v14 = vpack.c.bf16 %v50_v7, %v49_v6 }
  0x12   :  { %550 = vmatprep.subr.bf16.mxu0 %v549_v52  ;;  %v82_v9 = vld [vmem:[%s979_s1 + $0x1e8] sm:$0xff]  ;;  %v33_v11 = vld [vmem:[%s979_s1 + $0x60] sm:$0xff]  ;;  %v587_v13 = vpack.c.bf16 %v64_v5, %v63_v3  ;;  %v51_v19 = vld [vmem:[%s979_s1 + $0xf0] sm:$0xff] }
  0x13   :  { %580 = vmatpush3.bf16.msra.mxu1 %v579_v51  ;;  %v15_v12 = vld [vmem:[%s980_s0 + $0x8] sm:$0xff]  ;;  %v65_v16 = vld [vmem:[%s979_s1 + $0x160] sm:$0xff]  ;;  %v589_v18 = vpack.c.bf16 %v82_v9, %v81_v8  ;;  %v52_v20 = vld [vmem:[%s979_s1 + $0xf8] sm:$0xff] }
  0x14   :  { %582 = vmatprep.subr.bf16.mxu1 %v581_v56  ;;  %v34_v15 = vld [vmem:[%s979_s1 + $0x68] sm:$0xff]  ;;  %194 = vmatprep.mubr.f32.mxu0 %v15_v12  ;;  %v17_v21 = vld [vmem:[%s980_s0 + $0x18] sm:$0xff]  ;;  %v83_v22 = vld [vmem:[%s979_s1 + $0x1f0] sm:$0xff]  ;;  %v561_v26 = vpack.c.bf16 %v52_v20, %v51_v19 }
  0x15   :  { %552 = vmatpush3.bf16.msra.mxu0 %v551_v62  ;;  %v66_v17 = vld [vmem:[%s979_s1 + $0x168] sm:$0xff]  ;;  %v84_v23 = vld [vmem:[%s979_s1 + $0x1f8] sm:$0xff]  ;;  %264 = vmatprep.mubr.f32.mxu1 %v17_v21  ;;  %v559_v24 = vpack.c.bf16 %v34_v15, %v33_v11  ;;  %v35_v27 = vld [vmem:[%s979_s1 + $0x70] sm:$0xff] }
  0x16   :  { %554 = vmatprep.subr.bf16.mxu0 %v553_v0  ;;  %v591_v25 = vpack.c.bf16 %v66_v17, %v65_v16  ;;  %v36_v28 = vld [vmem:[%s979_s1 + $0x78] sm:$0xff]  ;;  %v67_v29 = vld [vmem:[%s979_s1 + $0x170] sm:$0xff]  ;;  %v593_v30 = vpack.c.bf16 %v84_v23, %v83_v22  ;;  %v101_v32 = vld [vmem:[%s979_s1 + $0x280] sm:$0xff] }
  0x17   :  { %584 = vmatpush3.bf16.msra.mxu1 %v583_v63  ;;  %v68_v31 = vld [vmem:[%s979_s1 + $0x178] sm:$0xff]  ;;  %v102_v33 = vld [vmem:[%s979_s1 + $0x288] sm:$0xff]  ;;  %v563_v34 = vpack.c.bf16 %v36_v28, %v35_v27  ;;  %v85_v37 = vld [vmem:[%s979_s1 + $0x200] sm:$0xff] }
  0x18   :  { %586 = vmatprep.subr.bf16.mxu1 %v585_v4  ;;  %v595_v35 = vpack.c.bf16 %v68_v31, %v67_v29  ;;  %v597_v36 = vpack.c.bf16 %v102_v33, %v101_v32  ;;  %v86_v38 = vld [vmem:[%s979_s1 + $0x208] sm:$0xff]  ;;  %v103_v39 = vld [vmem:[%s979_s1 + $0x290] sm:$0xff]  ;;  %v104_v40 = vld [vmem:[%s979_s1 + $0x298] sm:$0xff] }
  0x19   :  { %556 = vmatpush3.bf16.msra.mxu0 %v555_v10  ;;  %v14_v41 = vld [vmem:[%s980_s0] sm:$0xff]  ;;  %v599_v42 = vpack.c.bf16 %v86_v38, %v85_v37  ;;  %v16_v43 = vld [vmem:[%s980_s0 + $0x10] sm:$0xff]  ;;  %v601_v45 = vpack.c.bf16 %v104_v40, %v103_v39  ;;  %v88_v46 = vld [vmem:[%s979_s1 + $0x218] sm:$0xff] }
  0x1a   :  { %558 = vmatprep.subr.bf16.mxu0 %v557_v14  ;;  %v87_v44 = vld [vmem:[%s979_s1 + $0x210] sm:$0xff]  ;;  %v105_v47 = vld [vmem:[%s979_s1 + $0x2a0] sm:$0xff]  ;;  %v106_v48 = vld [vmem:[%s979_s1 + $0x2a8] sm:$0xff] }
  0x1b   :  { %588 = vmatpush3.bf16.msra.mxu1 %v587_v13  ;;  %v19_v49 = vld [vmem:[%s980_s0 + $0x28] sm:$0xff]  ;;  %v117_v51 = vld [vmem:[%s979_s1 + $0x300] sm:$0xff]  ;;  %v603_v54 = vpack.c.bf16 %v88_v46, %v87_v44  ;;  %v605_v55 = vpack.c.bf16 %v106_v48, %v105_v47  ;;  %v107_v58 = vld [vmem:[%s979_s1 + $0x2b0] sm:$0xff] }
  0x1c   :  { %590 = vmatprep.subr.bf16.mxu1 %v589_v18  ;;  %v118_v52 = vld [vmem:[%s979_s1 + $0x308] sm:$0xff]  ;;  %v89_v56 = vld [vmem:[%s979_s1 + $0x220] sm:$0xff]  ;;  %v108_v59 = vld [vmem:[%s979_s1 + $0x2b8] sm:$0xff] }
  0x1d   :  { %560 = vmatpush3.bf16.msra.mxu0 %v559_v24  ;;  %v630_v53 = vpack.c.bf16 %v118_v52, %v117_v51  ;;  %v90_v57 = vld [vmem:[%s979_s1 + $0x228] sm:$0xff]  ;;  %v20_v61 = vld [vmem:[%s980_s0 + $0x30] sm:$0xff]  ;;  %v609_v63 = vpack.c.bf16 %v108_v59, %v107_v58  ;;  %v92_v1 = vld [vmem:[%s979_s1 + $0x238] sm:$0xff] }
  0x1e   :  { %562 = vmatprep.subr.bf16.mxu0 %v561_v26  ;;  %v607_v62 = vpack.c.bf16 %v90_v57, %v89_v56  ;;  %v91_v0 = vld [vmem:[%s979_s1 + $0x230] sm:$0xff]  ;;  %v109_v2 = vld [vmem:[%s979_s1 + $0x2c0] sm:$0xff]  ;;  %v110_v3 = vld [vmem:[%s979_s1 + $0x2c8] sm:$0xff] }
  0x1f   :  { %592 = vmatpush3.bf16.msra.mxu1 %v591_v25  ;;  %v611_v4 = vpack.c.bf16 %v92_v1, %v91_v0  ;;  %v613_v5 = vpack.c.bf16 %v110_v3, %v109_v2  ;;  %v93_v6 = vld [vmem:[%s979_s1 + $0x240] sm:$0xff]  ;;  %v94_v7 = vld [vmem:[%s979_s1 + $0x248] sm:$0xff]  ;;  %v111_v8 = vld [vmem:[%s979_s1 + $0x2d0] sm:$0xff] }
  0x20   :  { %594 = vmatprep.subr.bf16.mxu1 %v593_v30  ;;  %v112_v9 = vld [vmem:[%s979_s1 + $0x2d8] sm:$0xff]  ;;  %v615_v10 = vpack.c.bf16 %v94_v7, %v93_v6  ;;  %v95_v12 = vld [vmem:[%s979_s1 + $0x250] sm:$0xff]  ;;  %v113_v14 = vld [vmem:[%s979_s1 + $0x2e0] sm:$0xff] }
  0x21   :  { %564 = vmatpush3.bf16.msra.mxu0 %v563_v34  ;;  %v617_v11 = vpack.c.bf16 %v112_v9, %v111_v8  ;;  %v96_v13 = vld [vmem:[%s979_s1 + $0x258] sm:$0xff]  ;;  %v114_v15 = vld [vmem:[%s979_s1 + $0x2e8] sm:$0xff]  ;;  %v97_v18 = vld [vmem:[%s979_s1 + $0x260] sm:$0xff] }
  0x22   :  { %598 = vmatprep.subr.bf16.mxu0 %v597_v36  ;;  %v619_v16 = vpack.c.bf16 %v96_v13, %v95_v12  ;;  %v621_v17 = vpack.c.bf16 %v114_v15, %v113_v14  ;;  %v98_v19 = vld [vmem:[%s979_s1 + $0x268] sm:$0xff]  ;;  %v115_v20 = vld [vmem:[%s979_s1 + $0x2f0] sm:$0xff]  ;;  %v116_v21 = vld [vmem:[%s979_s1 + $0x2f8] sm:$0xff] }
  0x23   :  { %596 = vmatpush3.bf16.msra.mxu1 %v595_v35  ;;  %v623_v22 = vpack.c.bf16 %v98_v19, %v97_v18  ;;  %v625_v23 = vpack.c.bf16 %v116_v21, %v115_v20  ;;  %v99_v24 = vld [vmem:[%s979_s1 + $0x270] sm:$0xff]  ;;  %v100_v25 = vld [vmem:[%s979_s1 + $0x278] sm:$0xff]  ;;  %v18_v27 = vld [vmem:[%s980_s0 + $0x20] sm:$0xff] }
  0x24   :  { %629 = vmatprep.subr.bf16.mxu1 %v635_v50  ;;  %195 = vmatmul.mubr.f32.vlgmr.msra.gmra.mrb[0].mxu0 %v14_v41  ;;  %v627_v26 = vpack.c.bf16 %v100_v25, %v99_v24  ;;  %v416_v29 = vld [vmem:[%s981_s2] ss:$0 sm:$0xff] }
  0x25   :  { %600 = vmatpush3.bf16.msra.mxu0 %v599_v42  ;;  %334 = vmatprep.mubr.f32.mxu0 %v19_v49 }
  0x26   :  { %265 = vmatmul.mubr.f32.vlgmr.msra.gmra.mrb[0].mxu1 %v16_v43  ;;  %602 = vmatprep.subr.bf16.mxu0 %v601_v45 }
  0x27   :  { %631 = vmatpush3.bf16.msra.mxu1 %v630_v53  ;;  %530 = vmatprep.mubr.msk.f32.mxu1 %vm636_vm0, %v637_v60 }
  0x29   :  { %604 = vmatpush3.bf16.msra.mxu0 %v603_v54 }
  0x2a   :  { %606 = vmatprep.subr.bf16.mxu0 %v605_v55  ;;  %531 = vmatmul.mubr.msk.f32.vlgmr.msra.gmra.mrb[2].mxu1 %vm126_vm1, %v20_v61 }
  0x2d   :  { %608 = vmatpush3.bf16.msra.mxu0 %v607_v62 }
  0x2e   :  { %610 = vmatprep.subr.bf16.mxu0 %v609_v63 }
  0x31   :  { %612 = vmatpush3.bf16.msra.mxu0 %v611_v4 }
  0x32   :  { %614 = vmatprep.subr.bf16.mxu0 %v613_v5 }
  0x35   :  { %616 = vmatpush3.bf16.msra.mxu0 %v615_v10 }
  0x36   :  { %618 = vmatprep.subr.bf16.mxu0 %v617_v11 }
  0x39   :  { %620 = vmatpush3.bf16.msra.mxu0 %v619_v16 }
  0x3a   :  { %622 = vmatprep.subr.bf16.mxu0 %v621_v17 }
  0x3d   :  { %624 = vmatpush3.bf16.msra.mxu0 %v623_v22 }
  0x3e   :  { %626 = vmatprep.subr.bf16.mxu0 %v625_v23 }
  0x41   :  { %628 = vmatpush3.bf16.msra.mxu0 %v627_v26 }
  0x44   :  { %335 = vmatmul.mubr.f32.vlgmr.msra.gmra.mrb[2].mxu0 %v18_v27 }
  0xf7   :  { %v450_v28 = vpop.f32.mrb[0].mxu0 }
  0xf8   :  { %v451_v30 = vpop.f32.mrb[1].mxu0 }
  0xf9   :  { %v485_v31 = vpop.f32.mrb[0].mxu1  ;;  %v452_v32 = vadd.f32 %v451_v30, %v450_v28 }
  0xfa   :  { %v486_v33 = vpop.f32.mrb[1].mxu1 }
  0xfb   :  { %v487_v34 = vadd.f32 %v486_v33, %v485_v31  ;;  %v197_v35 = vadd.f32 %v452_v32, %v416_v29 }
  0xfd   :  { %v267_v36 = vadd.f32 %v487_v34, %v197_v35  ;;  %v406_v37 = vpop.f32.mrb[2].mxu1 }
  0xfe   :  { %v532_v38 = vpop.f32.mrb[3].mxu1 }
 0x117   :  { %v520_v39 = vpop.f32.mrb[2].mxu0 }
 0x118   :  { %v521_v40 = vpop.f32.mrb[3].mxu0 }
 0x119   :  { %v522_v41 = vadd.f32 %v521_v40, %v520_v39 }
 0x11b   :  { %v337_v42 = vadd.f32 %v522_v41, %v267_v36 }
 0x11d   :  { %v407_v43 = vadd.f32 %v406_v37, %v337_v42 }
 0x11f   :  { %v410_v44 = vpack.c.bf16 %v407_v43, %v407_v43 }
 0x121   :  { %411 = vst [vmem:[%s982_s3] sm:$0xf] %v410_v44 }

</bundles_post_ra>
